<compile_context>
chip_gen: v5e
topology: v5e:2x2
jax: 0.10.0
libtpu: 0.0.40
codegen_flags: <defaults>
</compile_context>

<pallas_src>
import functools

import jax
import jax.numpy as jnp
from jax.experimental import pallas as pl
from jax.experimental.pallas import tpu as pltpu


# ----------------------------------------------------------------------------
# Tiling / VMEM policy (generation-aware: fits v7x's 64 MiB physical VMEM)
# ----------------------------------------------------------------------------
_TARGET_BLOCK_BYTES_F32 = 2 * 1024 * 1024      # per-input block, f32-equivalent
_VMEM_LIMIT_BYTES = 40 * 1024 * 1024           # explicit scoped-VMEM limit
_NUM_PARTITIONS = 2                            # leading "parallel" grid axis


def _sublane_packing(dtype):
    itemsize = jnp.dtype(dtype).itemsize
    return max(8, 32 // max(1, itemsize))      # 8 f32 / 16 bf16 / 32 int8


def _choose_tile_b(batch, feat, dtype):
    pack = _sublane_packing(dtype)
    if batch <= pack:
        return batch                           # single full-extent block (legal)
    # Size against the f32 working set (kernels upcast right after the DMA).
    max_rows = max(pack, _TARGET_BLOCK_BYTES_F32 // max(1, 4 * feat))
    tile = min(batch, max_rows)
    tile = max(pack, (tile // pack) * pack)    # round down to packing multiple
    return tile
    # TODO(synk): very wide rows (feat so large that a pack-row block exceeds
    # VMEM) would need feature-axis tiling; not needed for these loss heads.


# ----------------------------------------------------------------------------
# In-kernel helpers
# ----------------------------------------------------------------------------
def _row_mask(tile_b, tiles_per_part, total_rows):
    """[tile_b, 1] bool mask of rows that exist (cdiv grid may overshoot)."""
    p = pl.program_id(0)
    i = pl.program_id(1)
    row0 = (p * tiles_per_part + i) * tile_b
    rows = jax.lax.broadcasted_iota(jnp.int32, (tile_b, 1), 0) + row0
    return rows < total_rows


def _write_scalar(out_ref, acc_ref):
    """Finalize: single cross-lane reduce of the scratch, lane-dense store."""
    total = jnp.sum(acc_ref[...], axis=1, keepdims=True)          # (1, 1)
    lane = jax.lax.broadcasted_iota(jnp.int32, out_ref.shape, 1)
    out_ref[...] = jnp.where(lane == 0, total, 0.0)               # (1, 128)


# ----------------------------------------------------------------------------
# Kernels (batch-tiled; scratch acc is the per-partition accumulator)
# ----------------------------------------------------------------------------
def _make_cosine_kernel(*, tile_b, tiles_per_part, total_rows):
    def kernel(cxr_ref, ehr_ref, out_ref, acc_ref):
        i = pl.program_id(1)

        @pl.when(i == 0)
        def _():
            acc_ref[...] = jnp.zeros_like(acc_ref)

        valid = _row_mask(tile_b, tiles_per_part, total_rows)
        cxr = cxr_ref[...].astype(jnp.float32)
        ehr = ehr_ref[...].astype(jnp.float32)
        inv_e = jax.lax.rsqrt(jnp.sum(ehr * ehr, axis=1, keepdims=True))
        inv_c = jax.lax.rsqrt(jnp.sum(cxr * cxr, axis=1, keepdims=True))
        dots = jnp.sum(ehr * cxr, axis=1, keepdims=True) * inv_e * inv_c
        dots = jnp.where(valid, dots, 0.0)      # padded/garbage rows -> 0
        acc_ref[...] += jnp.sum(dots, axis=0, keepdims=True)

        @pl.when(i == pl.num_programs(1) - 1)
        def _():
            _write_scalar(out_ref, acc_ref)

    return kernel


def _make_kldiv_kernel(temperature):
    inv_t = 1.0 / float(temperature)

    def factory(*, tile_b, tiles_per_part, total_rows):
        def kernel(emb1_ref, emb2_ref, out_ref, acc_ref):
            i = pl.program_id(1)

            @pl.when(i == 0)
            def _():
                acc_ref[...] = jnp.zeros_like(acc_ref)

            valid = _row_mask(tile_b, tiles_per_part, total_rows)
            x1 = emb1_ref[...].astype(jnp.float32) * inv_t
            x2 = emb2_ref[...].astype(jnp.float32) * inv_t
            # log_softmax(emb1/T): reuse exp(s1) for both p and log p.
            s1 = x1 - jnp.max(x1, axis=1, keepdims=True)
            e1 = jnp.exp(s1)
            z1 = jnp.sum(e1, axis=1, keepdims=True)
            logp = s1 - jnp.log(z1)
            pvals = e1 * (1.0 / z1)
            # log_softmax(emb2/T)
            s2 = x2 - jnp.max(x2, axis=1, keepdims=True)
            logq = s2 - jnp.log(jnp.sum(jnp.exp(s2), axis=1, keepdims=True))
            # kl_div(input=logq, target=p, reduction='none') = p * (log p - log q)
            kl = jnp.where(valid, pvals * (logp - logq), 0.0)
            acc_ref[...] += jnp.sum(kl, axis=0, keepdims=True)    # (1, D)

            @pl.when(i == pl.num_programs(1) - 1)
            def _():
                _write_scalar(out_ref, acc_ref)

        return kernel

    return factory


def _make_ranking_kernel(neg_penalty):
    m = float(neg_penalty)

    def factory(*, tile_b, tiles_per_part, total_rows):
        def kernel(ranks_ref, labels_ref, loaded_ref, out_ref, acc_ref):
            i = pl.program_id(1)

            @pl.when(i == 0)
            def _():
                acc_ref[...] = jnp.zeros_like(acc_ref)

            valid = _row_mask(tile_b, tiles_per_part, total_rows)
            r = jnp.where(valid, ranks_ref[...].astype(jnp.float32), 0.0)
            lab = labels_ref[...].astype(jnp.float32)
            loaded = loaded_ref[...]                                # (1, C) mask
            pos = jnp.where(valid, (lab == 1.0).astype(jnp.float32) * loaded, 0.0)
            neg = jnp.where(valid, (lab == 0.0).astype(jnp.float32) * loaded, 0.0)
            num_classes = r.shape[1]

            per_row = jnp.zeros((r.shape[0], 1), jnp.float32)
            if num_classes <= 64:
                # Fully static inner loop: r_c / pos_c are static lane slices
                # (no masked cross-lane reduces per class).
                for c in range(num_classes):
                    r_c = r[:, c:c + 1]
                    pos_c = pos[:, c:c + 1]
                    pen = jnp.maximum(m + r - r_c, 0.0) * neg       # [tb, C]
                    per_row = per_row + pos_c * jnp.sum(pen, axis=1, keepdims=True)
            else:
                col = jax.lax.broadcasted_iota(jnp.int32, r.shape, 1)

                def body(c, acc):
                    sel = col == c
                    r_c = jnp.sum(jnp.where(sel, r, 0.0), axis=1, keepdims=True)
                    pos_c = jnp.sum(jnp.where(sel, pos, 0.0), axis=1, keepdims=True)
                    pen = jnp.maximum(m + r - r_c, 0.0) * neg
                    return acc + pos_c * jnp.sum(pen, axis=1, keepdims=True)

                per_row = jax.lax.fori_loop(0, num_classes, body, per_row, unroll=8)

            acc_ref[...] += jnp.sum(per_row, axis=0, keepdims=True)

            @pl.when(i == pl.num_programs(1) - 1)
            def _():
                _write_scalar(out_ref, acc_ref)

        return kernel

    return factory


def _make_bce_kernel(*, tile_b, tiles_per_part, total_rows):
    def kernel(x_ref, y_ref, out_ref, acc_ref):
        i = pl.program_id(1)

        @pl.when(i == 0)
        def _():
            acc_ref[...] = jnp.zeros_like(acc_ref)

        valid = _row_mask(tile_b, tiles_per_part, total_rows)
        x = x_ref[...].astype(jnp.float32)
        y = y_ref[...].astype(jnp.float32)
        # numerically stable BCEWithLogits: max(x,0) - x*y + log(1 + exp(-|x|))
        loss = jnp.maximum(x, 0.0) - x * y + jnp.log1p(jnp.exp(-jnp.abs(x)))
        loss = jnp.where(valid, loss, 0.0)
        acc_ref[...] += jnp.sum(loss, axis=0, keepdims=True)       # (1, D)

        @pl.when(i == pl.num_programs(1) - 1)
        def _():
            _write_scalar(out_ref, acc_ref)

    return kernel


# ----------------------------------------------------------------------------
# pallas_call wrapper: (parallel, arbitrary) grid, per-partition partial sums
# ----------------------------------------------------------------------------
def _batched_scalar_call(kernel_factory, tiled_inputs, broadcast_inputs=(),
                         acc_lanes=1):
    batch, feat = tiled_inputs[0].shape
    tile_b = _choose_tile_b(batch, feat, tiled_inputs[0].dtype)
    tiles_total = pl.cdiv(batch, tile_b)
    parts = _NUM_PARTITIONS if tiles_total >= _NUM_PARTITIONS else 1
    tiles_per_part = pl.cdiv(tiles_total, parts)

    def tiled_index_map(p, i):
        t = p * tiles_per_part + i
        return (jnp.minimum(t, tiles_total - 1), 0)   # clamp fully-OOB tiles

    in_specs = [pl.BlockSpec((tile_b, x.shape[1]), tiled_index_map)
                for x in tiled_inputs]
    for b in broadcast_inputs:
        in_specs.append(pl.BlockSpec(b.shape, lambda p, i: (0, 0)))

    kernel = kernel_factory(tile_b=tile_b, tiles_per_part=tiles_per_part,
                            total_rows=batch)

    out = pl.pallas_call(
        kernel,
        out_shape=jax.ShapeDtypeStruct((1, parts * 128), jnp.float32),
        grid=(parts, tiles_per_part),
        in_specs=in_specs,
        out_specs=pl.BlockSpec((1, 128), lambda p, i: (0, p)),
        scratch_shapes=[pltpu.VMEM((1, acc_lanes), jnp.float32)],
        compiler_params=pltpu.CompilerParams(
            dimension_semantics=("parallel", "arbitrary"),
            vmem_limit_bytes=_VMEM_LIMIT_BYTES),
    )(*tiled_inputs, *broadcast_inputs)
    # Only lane 0 of each 128-lane partition block is nonzero.
    return jnp.sum(out)


# ----------------------------------------------------------------------------
# Public loss functions (mean / "1 - x" transforms live in the wrapper)
# ----------------------------------------------------------------------------
def cosine_loss(cxr, ehr):
    total = _batched_scalar_call(_make_cosine_kernel, (cxr, ehr), acc_lanes=1)
    return 1.0 - total / cxr.shape[0]


def kldiv_loss(emb1, emb2, *, temperature):
    total = _batched_scalar_call(_make_kldiv_kernel(temperature), (emb1, emb2),
                                 acc_lanes=emb1.shape[1])
    return total / emb1.shape[0]


def ranking_loss(ranks, labels, class_ids_loaded, device=None, *, neg_penalty):
    num_classes = ranks.shape[1]
    # Fused gather: select loaded classes in-kernel with a dense lane mask
    # (single HBM pass over [B, C_full]; assumes class_ids_loaded is unique).
    loaded = jnp.zeros((1, num_classes), jnp.float32).at[0, class_ids_loaded].set(1.0)
    total = _batched_scalar_call(_make_ranking_kernel(neg_penalty),
                                 (ranks, labels), broadcast_inputs=(loaded,),
                                 acc_lanes=1)
    return (total / ranks.shape[0]).reshape(1)     # torch version returns shape (1,)


def bce_loss(logits, targets):
    n = logits.size
    # Lane-dense flattening: elementwise loss + global mean, so row structure
    # is irrelevant; reshape is a free layout-preserving op in the wrapper.
    lane = next((c for c in (2048, 1024, 512, 256, 128) if n % c == 0), None)
    if lane is not None:
        x = logits.reshape(n // lane, lane)
        y = targets.reshape(n // lane, lane)
    else:
        x, y = logits, targets
    total = _batched_scalar_call(_make_bce_kernel, (x, y), acc_lanes=x.shape[1])
    return total / n


class Loss:
    """JAX/Pallas mirror of models/loss_set.py::Loss."""

    def __init__(self, loss, temperature=2.0, neg_penalty=0.03):
        self.loss_name = loss.lower()
        if self.loss_name == "kldiv":
            self._fn = functools.partial(kldiv_loss, temperature=temperature)
        elif self.loss_name == "ranking":
            self._fn = functools.partial(ranking_loss, neg_penalty=neg_penalty)
        elif self.loss_name == "cosine":
            self._fn = cosine_loss
        elif self.loss_name == "bce":
            self._fn = bce_loss
        else:
            raise ValueError(f"Unknown loss function: {self.loss_name}")

    def __call__(self, *args, **kwargs):
        return self._fn(*args, **kwargs)


# ----------------------------------------------------------------------------
# Pure-JAX references (verification only)
# ----------------------------------------------------------------------------
def _cosine_ref(cxr, ehr):
    a = ehr / jnp.linalg.norm(ehr, axis=1, keepdims=True)
    b = cxr / jnp.linalg.norm(cxr, axis=1, keepdims=True)
    return 1.0 - jnp.mean(jnp.sum(a * b, axis=1))


def _kldiv_ref(emb1, emb2, t):
    p = jax.nn.softmax(emb1 / t, axis=1)
    logq = jax.nn.log_softmax(emb2 / t, axis=1)
    return jnp.mean(jnp.sum(p * (jnp.log(p) - logq), axis=1))


def _ranking_ref(ranks, labels, ids, neg_penalty):
    r = ranks[:, ids]
    lab = labels[:, ids]
    pos = (lab == 1.0).astype(jnp.float32)
    neg = (lab == 0.0).astype(jnp.float32)
    diff = neg_penalty + r[:, None, :] - r[:, :, None]
    pen = jnp.maximum(diff, 0.0) * pos[:, :, None] * neg[:, None, :]
    return jnp.sum(pen) / r.shape[0]


def _bce_ref(x, y):
    return jnp.mean(jnp.maximum(x, 0.0) - x * y + jnp.log1p(jnp.exp(-jnp.abs(x))))


def _close(a, b, tol=1e-4):
    a, b = float(a), float(b)
    return abs(a - b) <= tol * max(1.0, abs(b))


# ----------------------------------------------------------------------------
if __name__ == "__main__":
    key = jax.random.PRNGKey(0)
    k1, k2, k3, k4, k5, k6 = jax.random.split(key, 6)

    B, D = 4, 32          # embedding batch / hidden
    C_FULL = 14           # total classes for ranking
    class_ids_loaded = jnp.array([0, 2, 3, 5, 7, 8, 10, 13], dtype=jnp.int32)

    cxr = jax.random.normal(k1, (B, D), dtype=jnp.float32)
    ehr = jax.random.normal(k2, (B, D), dtype=jnp.float32)
    emb1 = jax.random.normal(k3, (B, D), dtype=jnp.float32)
    emb2 = jax.random.normal(k4, (B, D), dtype=jnp.float32)
    ranks = jax.random.normal(k5, (B, C_FULL), dtype=jnp.float32)
    labels = (jax.random.uniform(k6, (B, C_FULL)) > 0.5).astype(jnp.float32)

    temperature = 2.0
    neg_penalty = 0.03

    # cosine
    loss_cos = Loss("cosine")(cxr, ehr)
    jax.block_until_ready(loss_cos)
    assert _close(loss_cos, _cosine_ref(cxr, ehr))

    # kldiv
    loss_kl = Loss("kldiv", temperature=temperature)(emb1, emb2)
    jax.block_until_ready(loss_kl)
    assert _close(loss_kl, _kldiv_ref(emb1, emb2, temperature))

    # ranking
    loss_rank = Loss("ranking", neg_penalty=neg_penalty)(
        ranks, labels, class_ids_loaded, None
    )
    jax.block_until_ready(loss_rank)
    assert _close(loss_rank[0], _ranking_ref(ranks, labels, class_ids_loaded,
                                             neg_penalty))

    # bce
    logits = emb1
    targets = (jax.random.uniform(k2, (B, D)) > 0.5).astype(jnp.float32)
    loss_bce = Loss("bce")(logits, targets)
    jax.block_until_ready(loss_bce)
    assert _close(loss_bce, _bce_ref(logits, targets))

    print("KERNEL_OK")
</pallas_src>

<mosaic_0001>
module attributes {stable_mosaic.version = 11 : i64} {
  func.func @kernel(%arg0: i32, %arg1: i32, %arg2: memref<4x32xf32, #tpu.memory_space<vmem>>, %arg3: memref<4x32xf32, #tpu.memory_space<vmem>>, %arg4: memref<1x128xf32, #tpu.memory_space<vmem>>, %arg5: memref<1x1xf32, #tpu.memory_space<vmem>>) attributes {dimension_semantics = [#tpu.dimension_semantics<parallel>, #tpu.dimension_semantics<arbitrary>], iteration_bounds = array<i64: 1, 1>, scalar_prefetch = 0 : i64, scratch_operands = 1 : i64, tpu.core_type = #tpu.core_type<tc>, window_params = [{transform_indices = @transform_0, window_bounds = array<i64: 4, 32>}, {transform_indices = @transform_1, window_bounds = array<i64: 4, 32>}, {transform_indices = @transform_2, window_bounds = array<i64: 1, 128>}]} {
    %c0_i32 = arith.constant 0 : i32
    %0 = arith.cmpi eq, %arg1, %c0_i32 : i32
    %1 = arith.extui %0 : i1 to i32
    %c0_i32_0 = arith.constant 0 : i32
    %2 = arith.cmpi ne, %1, %c0_i32_0 : i32
    scf.if %2 {
      %cst_15 = arith.constant 0.000000e+00 : f32
      %36 = vector.broadcast %cst_15 : f32 to vector<1x1xf32>
      %c0_16 = arith.constant 0 : index
      %c0_17 = arith.constant 0 : index
      %37 = vector.load %arg5[%c0_16, %c0_17] : memref<1x1xf32, #tpu.memory_space<vmem>>, vector<1x1xf32>
      tpu.vector_store %arg5[%c0_16, %c0_17], %36 {strides = array<i32>} : memref<1x1xf32, #tpu.memory_space<vmem>>, vector<1x1xf32>,
    } else {
    }
    %c1_i32 = arith.constant 1 : i32
    %3 = arith.muli %arg0, %c1_i32 : i32
    %4 = arith.addi %3, %arg1 : i32
    %c4_i32 = arith.constant 4 : i32
    %5 = arith.muli %4, %c4_i32 : i32
    %6 = tpu.iota {dimensions = array<i32: 0>} : vector<4x1xi32>
    %7 = vector.broadcast %5 : i32 to vector<4x1xi32>
    %8 = arith.addi %6, %7 : vector<4x1xi32>
    %c4_i32_1 = arith.constant 4 : i32
    %9 = vector.broadcast %c4_i32_1 : i32 to vector<4x1xi32>
    %10 = arith.cmpi slt, %8, %9 : vector<4x1xi32>
    %c0 = arith.constant 0 : index
    %c0_2 = arith.constant 0 : index
    %11 = vector.load %arg2[%c0, %c0_2] : memref<4x32xf32, #tpu.memory_space<vmem>>, vector<4x32xf32>
    %c0_3 = arith.constant 0 : index
    %c0_4 = arith.constant 0 : index
    %12 = vector.load %arg3[%c0_3, %c0_4] : memref<4x32xf32, #tpu.memory_space<vmem>>, vector<4x32xf32>
    %13 = arith.mulf %12, %12 : vector<4x32xf32>
    %cst = arith.constant dense<0.000000e+00> : vector<4xf32>
    %14 = vector.multi_reduction <add>, %13, %cst [1] : vector<4x32xf32> to vector<4xf32>
    %15 = vector.shape_cast %14 : vector<4xf32> to vector<4x1xf32>
    %16 = math.rsqrt %15 : vector<4x1xf32>
    %17 = arith.mulf %11, %11 : vector<4x32xf32>
    %cst_5 = arith.constant dense<0.000000e+00> : vector<4xf32>
    %18 = vector.multi_reduction <add>, %17, %cst_5 [1] : vector<4x32xf32> to vector<4xf32>
    %19 = vector.shape_cast %18 : vector<4xf32> to vector<4x1xf32>
    %20 = math.rsqrt %19 : vector<4x1xf32>
    %21 = arith.mulf %12, %11 : vector<4x32xf32>
    %cst_6 = arith.constant dense<0.000000e+00> : vector<4xf32>
    %22 = vector.multi_reduction <add>, %21, %cst_6 [1] : vector<4x32xf32> to vector<4xf32>
    %23 = vector.shape_cast %22 : vector<4xf32> to vector<4x1xf32>
    %24 = arith.mulf %23, %16 : vector<4x1xf32>
    %25 = arith.mulf %24, %20 : vector<4x1xf32>
    %cst_7 = arith.constant 0.000000e+00 : f32
    %26 = vector.broadcast %cst_7 : f32 to vector<4x1xf32>
    %27 = arith.select %10, %25, %26 : vector<4x1xi1>, vector<4x1xf32>
    %c0_8 = arith.constant 0 : index
    %c0_9 = arith.constant 0 : index
    %28 = vector.load %arg5[%c0_8, %c0_9] : memref<1x1xf32, #tpu.memory_space<vmem>>, vector<1x1xf32>
    %cst_10 = arith.constant dense<0.000000e+00> : vector<1xf32>
    %29 = vector.multi_reduction <add>, %27, %cst_10 [0] : vector<4x1xf32> to vector<1xf32>
    %30 = vector.shape_cast %29 : vector<1xf32> to vector<1x1xf32>
    %31 = arith.addf %28, %30 : vector<1x1xf32>
    %c0_11 = arith.constant 0 : index
    %c0_12 = arith.constant 0 : index
    %32 = vector.load %arg5[%c0_11, %c0_12] : memref<1x1xf32, #tpu.memory_space<vmem>>, vector<1x1xf32>
    tpu.vector_store %arg5[%c0_11, %c0_12], %31 {strides = array<i32>} : memref<1x1xf32, #tpu.memory_space<vmem>>, vector<1x1xf32>,
    %c0_i32_13 = arith.constant 0 : i32
    %33 = arith.cmpi eq, %arg1, %c0_i32_13 : i32
    %34 = arith.extui %33 : i1 to i32
    %c0_i32_14 = arith.constant 0 : i32
    %35 = arith.cmpi ne, %34, %c0_i32_14 : i32
    scf.if %35 {
      %c0_15 = arith.constant 0 : index
      %c0_16 = arith.constant 0 : index
      %36 = vector.load %arg5[%c0_15, %c0_16] : memref<1x1xf32, #tpu.memory_space<vmem>>, vector<1x1xf32>
      %cst_17 = arith.constant dense<0.000000e+00> : vector<1xf32>
      %37 = vector.multi_reduction <add>, %36, %cst_17 [1] : vector<1x1xf32> to vector<1xf32>
      %38 = vector.shape_cast %37 : vector<1xf32> to vector<1x1xf32>
      %39 = tpu.iota {dimensions = array<i32: 1>} : vector<1x128xi32>
      %c0_i32_18 = arith.constant 0 : i32
      %40 = vector.broadcast %c0_i32_18 : i32 to vector<1x128xi32>
      %41 = arith.cmpi eq, %39, %40 : vector<1x128xi32>
      %cst_19 = arith.constant 0.000000e+00 : f32
      %42 = vector.shape_cast %38 : vector<1x1xf32> to vector<1x1xf32>
      %43 = vector.broadcast %42 : vector<1x1xf32> to vector<1x128xf32>
      %44 = vector.broadcast %cst_19 : f32 to vector<1x128xf32>
      %45 = arith.select %41, %43, %44 : vector<1x128xi1>, vector<1x128xf32>
      %c0_20 = arith.constant 0 : index
      %c0_21 = arith.constant 0 : index
      %46 = vector.load %arg4[%c0_20, %c0_21] : memref<1x128xf32, #tpu.memory_space<vmem>>, vector<1x128xf32>
      tpu.vector_store %arg4[%c0_20, %c0_21], %45 {strides = array<i32>} : memref<1x128xf32, #tpu.memory_space<vmem>>, vector<1x128xf32>,
    } else {
    }
    return
  }
  func.func @transform_0(%arg0: i32, %arg1: i32) -> (i32, i32) {
    %c1_i32 = arith.constant 1 : i32
    %0 = arith.muli %arg0, %c1_i32 : i32
    %1 = arith.addi %0, %arg1 : i32
    %c0_i32 = arith.constant 0 : i32
    %2 = arith.minsi %1, %c0_i32 : i32
    %c0_i32_0 = arith.constant 0 : i32
    %c0_i32_1 = arith.constant 0 : i32
    return %2, %c0_i32_0 : i32, i32
  }
  func.func @transform_1(%arg0: i32, %arg1: i32) -> (i32, i32) {
    %c1_i32 = arith.constant 1 : i32
    %0 = arith.muli %arg0, %c1_i32 : i32
    %1 = arith.addi %0, %arg1 : i32
    %c0_i32 = arith.constant 0 : i32
    %2 = arith.minsi %1, %c0_i32 : i32
    %c0_i32_0 = arith.constant 0 : i32
    %c0_i32_1 = arith.constant 0 : i32
    return %2, %c0_i32_0 : i32, i32
  }
  func.func @transform_2(%arg0: i32, %arg1: i32) -> (i32, i32) {
    %c0_i32 = arith.constant 0 : i32
    %c0_i32_0 = arith.constant 0 : i32
    return %c0_i32, %arg0 : i32, i32
  }
}

</mosaic_0001>

<bundles_post_ra>
// kernel: tpu_custom_call.1
= control target key start
LH: loop header
LB: loop body
LE: loop exit
PB: predicated region body
PF: predicated region fallthrough
CT: control target
= control target key end

     0   :  { %7 = vsyncpa [#allocation4], 0  ;;  %s277_s0 = inlined_call_operand.hbm [shape: f32[4,32], index: 0, kind: input, shape index: {}]   ;;  %s278_s1 = inlined_call_operand.hbm [shape: f32[4,32], index: 1, kind: input, shape index: {}]   ;;  %s279_s2 = inlined_call_operand.hbm [shape: f32[1,128], index: 2, kind: output, shape index: {}]  }
   0x1   :  { %8 = vsyncpa [#allocation7], 0 }
   0x2   :  { %9 = vsyncpa [#allocation5], 0  ;;  %s20_s11 = sshll.u32 %s277_s0, 4  ;;  %s246_s12 = smov [#allocation3]   ;;  %s21_s11 = int_to_ptr.hbm [resolvable:$true] %s20_s11 }
   0x3   :  { %s22_s13 = sshll.u32 %s246_s12, 4  ;;  %s36_s16 = sshll.u32 %s278_s1, 4  ;;  %s23_s13 = int_to_ptr.vmem [resolvable:$true] %s22_s13  ;;  %s37_s16 = int_to_ptr.hbm [resolvable:$true] %s36_s16 }
   0x4   :  { %25 = dma.hbm_to_vmem [thread:$0]  %s21_s11, 64, %s23_s13, [#allocation4]  }
   0x5   :  { %s247_s17 = smov [#allocation6]  }
   0x6   :  { %s38_s18 = sshll.u32 %s247_s17, 4  ;;  %s39_s18 = int_to_ptr.vmem [resolvable:$true] %s38_s18 }
   0x7   :  { %41 = dma.hbm_to_vmem [thread:$0]  %s37_s16, 64, %s39_s18, [#allocation7]  }
   0x8   :  { %240 = dma.done.wait [#allocation4], 64  }
   0x9   :  { %241 = vsyncadd [#allocation4], 4294967232 }
   0xa   :  { %242 = dma.done.wait [#allocation7], 64  }
   0xb   :  { %243 = vsyncadd [#allocation7], 4294967232  ;;  %vm60_vm0 = vcmask 0   ;;  %v248_v0 = vmov 0.0   ;;  %v70_v1 = vld [vmem:[#allocation6] sm:$0xf]  ;;  %v64_v20 = vlaneseq }
   0xc   :  { %61 = vst.msk [vmem:[#allocation2] sm:$0x1] %vm60_vm0, %v248_v0  ;;  %vm72_vm1 = vcmask 257024   ;;  %v69_v2 = vld [vmem:[#allocation3] sm:$0xf]  ;;  %v71_v3 = vmul.f32 %v70_v1, %v70_v1  ;;  %v249_v16 = vmov 0  }
   0xd   :  { %v100_v4 = vmul.f32 %v70_v1, %v69_v2  ;;  %v86_v7 = vmul.f32 %v69_v2, %v69_v2  ;;  %162 = vset.pattern.permute.xlu1 %v249_v16  ;;  %163 = vset.pattern.permute.xlu0 %v249_v16  ;;  %v65_v24 = vshrl.u32 %v64_v20, 7  ;;  %vm108_vm9 = vcmask 1043456   ;;  %s250_s0 = smov [#allocation8]   ;;  %s142_s21 = sshll.u32 %s279_s2, 4  ;;  %s143_s21 = int_to_ptr.hbm [resolvable:$true] %s142_s21 }
   0xe   :  { %v73_v5 = vsel %vm72_vm1, %v71_v3, 0.0  ;;  %v125_v42 = vand.u32 127, %v64_v20  ;;  %s140_s1 = sshll.u32 %s250_s0, 4  ;;  %s141_s1 = int_to_ptr.vmem [resolvable:$true] %s140_s1 }
   0xf   :  { %v101_v6 = vsel %vm72_vm1, %v100_v4, 0.0  ;;  %74 = vadd.xlane.f32.xlu0 %v73_v5  ;;  %v87_v8 = vsel %vm72_vm1, %v86_v7, 0.0  ;;  %vm68_vm8 = vcmp.lt.s32.totalorder %v65_v24, 4 }
  0x10   :  { %102 = vadd.xlane.f32.xlu1 %v101_v6  ;;  %vm126_vm10 = vcmp.eq.s32.totalorder %v125_v42, 0 }
  0x13   :  { %v107_v38 = vld [vmem:[#allocation2] sm:$0x1] }
  0x17   :  { %88 = vadd.xlane.f32.xlu0 %v87_v8 }
  0x82   :  { %v75_v9 = vpop.xlane.xlu0 %74 }
  0x83   :  { %164 = vrsqrt.f32 %v75_v9  ;;  %vm82_vm3 = vweird.f32 %v75_v9  ;;  %v103_v26 = vpop.xlane.xlu1 %102 }
  0x89   :  { %v165_v10 = vpop.eup %164 }
  0x8a   :  { %v77_v11 = vmul.f32 %v165_v10, %v75_v9  ;;  %v89_v12 = vpop.xlane.xlu0 %88  ;;  %vm83_vm2 = vweird.f32 %v165_v10 }
  0x8b   :  { %166 = vrsqrt.f32 %v89_v12  ;;  %vm84_vm4 = vmor %vm82_vm3, %vm83_vm2  ;;  %vm96_vm6 = vweird.f32 %v89_v12 }
  0x8c   :  { %v78_v13 = vmul.f32 %v165_v10, %v77_v11 }
  0x8e   :  { %v79_v14 = vmul.f32 0.5, %v78_v13 }
  0x90   :  { %v80_v15 = vsub.f32 1.5, %v79_v14 }
  0x91   :  { %v167_v17 = vpop.eup %166 }
  0x92   :  { %v91_v18 = vmul.f32 %v167_v17, %v89_v12  ;;  %v81_v21 = vmul.f32 %v165_v10, %v80_v15  ;;  %vm97_vm5 = vweird.f32 %v167_v17 }
  0x93   :  { %vm98_vm7 = vmor %vm96_vm6, %vm97_vm5 }
  0x94   :  { %v92_v19 = vmul.f32 %v167_v17, %v91_v18  ;;  %v85_v25 = vsel %vm84_vm4, %v165_v10, %v81_v21 }
  0x95   :  { %v104_v28 = vmul.f32 %v103_v26, %v85_v25 }
  0x96   :  { %v93_v22 = vmul.f32 0.5, %v92_v19 }
  0x98   :  { %v94_v23 = vsub.f32 1.5, %v93_v22 }
  0x9a   :  { %v95_v27 = vmul.f32 %v167_v17, %v94_v23 }
  0x9c   :  { %v99_v29 = vsel %vm98_vm7, %v167_v17, %v95_v27 }
  0x9d   :  { %v105_v30 = vmul.f32 %v104_v28, %v99_v29 }
  0x9f   :  { %v106_v31 = vsel %vm68_vm8, %v105_v30, 0.0 }
  0xa0   :  { %v109_v32 = vsel %vm108_vm9, %v106_v31, 0.0 }
  0xa1   :  { %v110_v33 = vrot.slane %v109_v32, 4 }
  0xa3   :  { %v111_v34 = vadd.f32 %v110_v33, %v109_v32 }
  0xa5   :  { %v112_v35 = vrot.slane %v111_v34, 2 }
  0xa7   :  { %v113_v36 = vadd.f32 %v112_v35, %v111_v34 }
  0xa9   :  { %v114_v37 = vrot.slane %v113_v36, 1 }
  0xab   :  { %v115_v39 = vadd.f32 %v114_v37, %v113_v36 }
  0xad   :  { %v116_v40 = vadd.f32 %v115_v39, %v107_v38 }
  0xaf   :  { %118 = vst.msk [vmem:[#allocation2] sm:$0x1] %vm60_vm0, %v116_v40 }
  0xb6   :  { %v122_v41 = vld [vmem:[#allocation2] sm:$0x1] }
  0xb7   :  { %129 = vperm.xlu1 %162, %v122_v41  }
 0x129   :  { %v130_v43 = vpop.permute.xlu1 %129 }
 0x12a   :  { %v132_v44 = vperm.slane %v130_v43, 0 }
 0x12c   :  { %v133_v45 = vsel %vm126_vm10, %v132_v44, 0.0 }
 0x12d   :  { %134 = vst [vmem:[#allocation8] sm:$0x1] %v133_v45 }
 0x12e   :  { %145 = dma.vmem_to_hbm [thread:$0]  %s141_s1, 16, %s143_s21, [#allocation5]  }
 0x12f   :  { %244 = dma.done.wait [#allocation5], 16  }
 0x130   :  { %245 = vsyncadd [#allocation5], 4294967280 }
 0x131   :  { %150 = vsyncpa [#allocation4], 1 }
 0x132   :  { %151 = vsyncpa [#allocation7], 1 }
 0x133   :  { %152 = vsyncpa [#allocation5], 1 }

</bundles_post_ra>
